<compile_context>
chip_gen: v6e
topology: v6e:2x2x1
jax: 0.10.0
libtpu: 0.0.40
codegen_flags: <defaults>
</compile_context>

<pallas_src>
import numpy as np
import jax
import jax.numpy as jnp
from jax.experimental import pallas as pl
from jax.experimental.pallas import tpu as pltpu


# ----------------------------------------------------------------------------
# Parameter construction (glue, plain JAX). Mirrors s_space_code_process:
# a [1, 9088] array of 0.5 is split into 17 conv-style chunks and 9 torgb
# chunks (StyleGAN2 1024px S-space) and re-concatenated in the interleaved
# S_ST order by get_coefficient().  The coefficient is a frozen parameter,
# so we build it once and cache the concatenated device array.
# ----------------------------------------------------------------------------
STYLE_DIMS = [512,                    # b4   conv1
              512, 512,               # b8   conv0/conv1
              512, 512,               # b16
              512, 512,               # b32
              512, 512,               # b64
              512, 256,               # b128
              256, 128,               # b256
              128, 64,                # b512
              64, 32]                 # b1024
TORGB_DIMS = [512, 512, 512, 512, 512, 256, 128, 64, 32]

assert sum(STYLE_DIMS) == 6048 and sum(TORGB_DIMS) == 3040


def get_coefficient(style, torgb, latent_type):
    """Re-implements get_coefficient / tensor_cat_style_trgb (concat along dim 1)."""
    if latent_type == "S_ST":
        pieces = [style[0], torgb[0]]
        for i in range(1, 9):
            pieces += [style[2 * i - 1], style[2 * i], torgb[i]]
    elif latent_type == "S_S":
        pieces = [style[0]]
        for i in range(1, 9):
            pieces += [style[2 * i - 1], style[2 * i]]
    elif latent_type == "S_T":
        pieces = list(torgb)
    else:
        raise ValueError(latent_type)
    return jnp.concatenate(pieces, axis=1)  # [1, D]


def build_style_intervention_params(latent_type="S_ST"):
    """Deterministic init: every chunk is 0.5 (matches the PyTorch __init__).

    The concatenated coefficient is precomputed here (it is a frozen parameter),
    so the per-call forward path does NOT pay for 26 small concat ops.
    """
    style = [jnp.full((1, d), 0.5, jnp.float32) for d in STYLE_DIMS]
    torgb = [jnp.full((1, d), 0.5, jnp.float32) for d in TORGB_DIMS]
    coefficient = get_coefficient(style, torgb, latent_type)
    coefficient = jax.block_until_ready(coefficient)   # cached device array [1, D]
    return {
        "style": style,
        "torgb": torgb,
        "latent_type": latent_type,
        "coefficient": coefficient,
    }


# ----------------------------------------------------------------------------
# Pallas kernel:  out = delta_sz + c * (delta_sn - delta_sz)
#                     == (1 - c) * delta_sz + c * delta_sn
# Single full-array block: D = 9088 is a multiple of 128 (lane axis) and the
# batch block equals the full batch dim, so the (8,128) BlockSpec rule holds.
# ----------------------------------------------------------------------------
def _intervention_kernel(coef_ref, sz_ref, sn_ref, out_ref):
    c = coef_ref[...]                       # (1, D) -> broadcasts over batch
    sz = sz_ref[...]                        # (B, D)
    sn = sn_ref[...]                        # (1 or B, D)
    out_ref[...] = sz + c * (sn - sz)


def style_intervention_forward(params, delta_sz, delta_sn):
    coefficient = params["coefficient"]     # cached [1, D]
    B, D = delta_sz.shape
    if coefficient.shape[1] != D or coefficient.shape[1] != delta_sn.shape[1]:
        raise ValueError(
            f"channel mismatch: expected {coefficient.shape[1]}, "
            f"got delta_sz={delta_sz.shape}, delta_sn={delta_sn.shape}")

    sn_b = delta_sn.shape[0]                # 1 or B (broadcast handled in-kernel)

    # Whole problem is ~290 KB -> one grid step, full-array blocks (no tiling).
    return pl.pallas_call(
        _intervention_kernel,
        out_shape=jax.ShapeDtypeStruct((B, D), delta_sz.dtype),
        grid_spec=pltpu.PrefetchScalarGridSpec(
            num_scalar_prefetch=0,
            grid=(1,),
            in_specs=[
                pl.BlockSpec((1, D), lambda i: (0, 0)),       # coefficient
                pl.BlockSpec((B, D), lambda i: (0, 0)),       # delta_sz
                pl.BlockSpec((sn_b, D), lambda i: (0, 0)),    # delta_sn
            ],
            out_specs=pl.BlockSpec((B, D), lambda i: (0, 0)),
        ),
        compiler_params=pltpu.CompilerParams(
            dimension_semantics=("arbitrary",),
            # Explicit headroom so the full-block strategy also works on
            # v7x's 64 MiB VMEM if batch ever grows.
            vmem_limit_bytes=64 * 1024 * 1024,
        ),
    )(coefficient, delta_sz, delta_sn)


if __name__ == "__main__":
    params = build_style_intervention_params("S_ST")
    D = 9088
    B = 2

    key = jax.random.PRNGKey(0)
    k1, k2 = jax.random.split(key)
    delta_sz = jax.random.normal(k1, (B, D), dtype=jnp.float32)
    delta_sn = jax.random.normal(k2, (1, D), dtype=jnp.float32)   # broadcast over batch

    out = style_intervention_forward(params, delta_sz, delta_sn)
    out = jax.block_until_ready(out)

    # Pure-JAX reference check.
    coef = params["coefficient"]
    ref = (1.0 - coef) * delta_sz + coef * delta_sn
    np.testing.assert_allclose(np.asarray(out), np.asarray(ref), rtol=1e-6, atol=1e-6)

    print("KERNEL_OK")
</pallas_src>

<mosaic_0001>
module attributes {stable_mosaic.version = 11 : i64} {
  func.func @_intervention_kernel(%arg0: i32, %arg1: memref<1x9088xf32, #tpu.memory_space<vmem>>, %arg2: memref<2x9088xf32, #tpu.memory_space<vmem>>, %arg3: memref<1x9088xf32, #tpu.memory_space<vmem>>, %arg4: memref<2x9088xf32, #tpu.memory_space<vmem>>) attributes {dimension_semantics = [#tpu.dimension_semantics<arbitrary>], iteration_bounds = array<i64: 1>, scalar_prefetch = 0 : i64, scratch_operands = 0 : i64, tpu.core_type = #tpu.core_type<tc>, window_params = [{pipeline_mode = #tpu.pipeline_mode<synchronous>, transform_indices = @transform_0, window_bounds = array<i64: 1, 9088>}, {pipeline_mode = #tpu.pipeline_mode<synchronous>, transform_indices = @transform_1, window_bounds = array<i64: 2, 9088>}, {pipeline_mode = #tpu.pipeline_mode<synchronous>, transform_indices = @transform_2, window_bounds = array<i64: 1, 9088>}, {pipeline_mode = #tpu.pipeline_mode<synchronous>, transform_indices = @transform_3, window_bounds = array<i64: 2, 9088>}]} {
    %c0 = arith.constant 0 : index
    %c0_0 = arith.constant 0 : index
    %0 = vector.load %arg1[%c0, %c0_0] : memref<1x9088xf32, #tpu.memory_space<vmem>>, vector<1x9088xf32>
    %c0_1 = arith.constant 0 : index
    %c0_2 = arith.constant 0 : index
    %1 = vector.load %arg2[%c0_1, %c0_2] : memref<2x9088xf32, #tpu.memory_space<vmem>>, vector<2x9088xf32>
    %c0_3 = arith.constant 0 : index
    %c0_4 = arith.constant 0 : index
    %2 = vector.load %arg3[%c0_3, %c0_4] : memref<1x9088xf32, #tpu.memory_space<vmem>>, vector<1x9088xf32>
    %3 = vector.broadcast %2 : vector<1x9088xf32> to vector<2x9088xf32>
    %4 = arith.subf %3, %1 : vector<2x9088xf32>
    %5 = vector.broadcast %0 : vector<1x9088xf32> to vector<2x9088xf32>
    %6 = arith.mulf %5, %4 : vector<2x9088xf32>
    %7 = arith.addf %1, %6 : vector<2x9088xf32>
    %c0_5 = arith.constant 0 : index
    %c0_6 = arith.constant 0 : index
    %8 = vector.load %arg4[%c0_5, %c0_6] : memref<2x9088xf32, #tpu.memory_space<vmem>>, vector<2x9088xf32>
    tpu.vector_store %arg4[%c0_5, %c0_6], %7 {strides = array<i32>} : memref<2x9088xf32, #tpu.memory_space<vmem>>, vector<2x9088xf32>,
    return
  }
  func.func @transform_0(%arg0: i32) -> (i32, i32) {
    %c0_i32 = arith.constant 0 : i32
    %c0_i32_0 = arith.constant 0 : i32
    %c0_i32_1 = arith.constant 0 : i32
    return %c0_i32, %c0_i32_0 : i32, i32
  }
  func.func @transform_1(%arg0: i32) -> (i32, i32) {
    %c0_i32 = arith.constant 0 : i32
    %c0_i32_0 = arith.constant 0 : i32
    %c0_i32_1 = arith.constant 0 : i32
    return %c0_i32, %c0_i32_0 : i32, i32
  }
  func.func @transform_2(%arg0: i32) -> (i32, i32) {
    %c0_i32 = arith.constant 0 : i32
    %c0_i32_0 = arith.constant 0 : i32
    %c0_i32_1 = arith.constant 0 : i32
    return %c0_i32, %c0_i32_0 : i32, i32
  }
  func.func @transform_3(%arg0: i32) -> (i32, i32) {
    %c0_i32 = arith.constant 0 : i32
    %c0_i32_0 = arith.constant 0 : i32
    %c0_i32_1 = arith.constant 0 : i32
    return %c0_i32, %c0_i32_0 : i32, i32
  }
}

</mosaic_0001>

<bundles_post_ra>
// kernel: tpu_custom_call.1
= control target key start
LH: loop header
LB: loop body
LE: loop exit
PB: predicated region body
PF: predicated region fallthrough
CT: control target
= control target key end

     0   :  { %8 = vsyncpa [#allocation3], 0  ;;  %s2425_s0 = inlined_call_operand.hbm [shape: f32[1,9088], index: 0, kind: input, shape index: {}]   ;;  %s2426_s1 = inlined_call_operand.hbm [shape: f32[2,9088], index: 1, kind: input, shape index: {}]   ;;  %s2427_s2 = inlined_call_operand.hbm [shape: f32[1,9088], index: 2, kind: input, shape index: {}]   ;;  %s2428_s3 = inlined_call_operand.hbm [shape: f32[2,9088], index: 3, kind: output, shape index: {}]  }
   0x1   :  { %9 = vsyncpa [#allocation6], 0 }
   0x2   :  { %10 = vsyncpa [#allocation4], 0  ;;  %s1905_s12 = smov [#allocation5]   ;;  %s1906_s14 = smov [#allocation2]  }
   0x3   :  { %s27_s13 = sshll.u32 %s1905_s12, 4  ;;  %s17_s15 = sshll.u32 %s1906_s14, 4  ;;  %s28_s13 = int_to_ptr.vmem [resolvable:$true] %s27_s13  ;;  %s18_s15 = int_to_ptr.vmem [resolvable:$true] %s17_s15 }
   0x4   :  { %s1827_s16 = scalar_lea.vmem %s28_s13, 2272  ;;  %p1832_p1 = scmp.lt.s32.totalorder %s28_s13, %s28_s13 }
   0x5   :  { %p1828_p0 = scmp.ne.s32.totalorder %s28_s13, %s1827_s16  ;;  %p1833_p2 = scmp.lt.s32.totalorder %s1827_s16, %s1827_s16 }
   0x7   :  { %p1834_p3 = por %p1833_p2, %p1832_p1 }
   0x9   :  { %p1835_p4 = pnand %p1834_p3, %p1828_p0 }
   0xb   :  { %1838 = shalt.err (!%p1835_p4)
}
   0xc   :  { %30 = dma.hbm_to_vmem [thread:$0]  %s2426_s1, 2272, %s28_s13, [#allocation6]  }
   0xd   :  { %s1847_s19 = scalar_lea.vmem %s18_s15, 1136  ;;  %s1851_s20 = scalar_lea.vmem %s18_s15, 1152 }
   0xe   :  { %p1848_p5 = scmp.ne.s32.totalorder %s18_s15, %s1847_s19  ;;  %p1852_p6 = scmp.lt.s32.totalorder %s18_s15, %s18_s15 }
   0xf   :  { %p1853_p7 = scmp.lt.s32.totalorder %s1851_s20, %s1847_s19 }
  0x11   :  { %p1854_p8 = por %p1853_p7, %p1852_p6 }
  0x13   :  { %p1855_p9 = pnand %p1854_p8, %p1848_p5 }
  0x15   :  { %1858 = shalt.err (!%p1855_p9)
}
  0x16   :  { %20 = dma.hbm_to_vmem [thread:$0]  %s2425_s0, 1136, %s18_s15, [#allocation3]  }
  0x17   :  { %s1907_s23 = smov [#allocation7]  }
  0x18   :  { %s37_s24 = sshll.u32 %s1907_s23, 4  ;;  %s38_s24 = int_to_ptr.vmem [resolvable:$true] %s37_s24 }
  0x19   :  { %s1867_s25 = scalar_lea.vmem %s38_s24, 1136  ;;  %s1871_s26 = scalar_lea.vmem %s38_s24, 1152 }
  0x1a   :  { %p1868_p10 = scmp.ne.s32.totalorder %s38_s24, %s1867_s25  ;;  %p1872_p11 = scmp.lt.s32.totalorder %s38_s24, %s38_s24 }
  0x1b   :  { %p1873_p12 = scmp.lt.s32.totalorder %s1871_s26, %s1867_s25 }
  0x1d   :  { %p1874_p13 = por %p1873_p12, %p1872_p11 }
  0x1f   :  { %p1875_p0 = pnand %p1874_p13, %p1868_p10 }
  0x21   :  { %1878 = shalt.err (!%p1875_p0)
}
  0x22   :  { %40 = dma.hbm_to_vmem [thread:$0]  %s2427_s2, 1136, %s38_s24, [#allocation6]  }
  0x23   :  { %1899 = dma.done.wait [#allocation3], 1136  }
  0x24   :  { %1900 = vsyncadd [#allocation3], 4294966160 }
  0x25   :  { %1901 = dma.done.wait [#allocation6], 3408  }
  0x26   :  { %1902 = vsyncadd [#allocation6], 4294963888  ;;  %v95_v0 = vlaneseq  ;;  %v1908_v1 = vmov 1983009808   ;;  %v50_v12 = vld [vmem:[#allocation2] sm:$0xff]  ;;  %v1953_v13 = vld [vmem:[#allocation5] sm:$0xff] }
  0x27   :  { %v470_v2 = vunpack.c.l.s4 %v1908_v1  ;;  %v77_v14 = vld [vmem:[#allocation7] sm:$0xff]  ;;  %v468_v21 = vcombine.high %v1953_v13, %v1953_v13  ;;  %v1985_v46 = vld [vmem:[#allocation7 + $0x8] sm:$0xff]  ;;  %v1993_v63 = vld [vmem:[#allocation2 + $0x8] sm:$0xff]  ;;  %s1909_s0 = smov [#allocation8]  }
  0x28   :  { %v96_v3 = vshrl.u32 %v95_v0, 7  ;;  %v1969_v25 = vld [vmem:[#allocation5 + $0x8] sm:$0xff]  ;;  %v1989_v58 = vld [vmem:[#allocation5 + $0x10] sm:$0xff]  ;;  %s1786_s2 = sshll.u32 %s1909_s0, 4  ;;  %s1787_s2 = int_to_ptr.vmem [resolvable:$true] %s1786_s2 }
  0x29   :  { %v471_v4 = vunpack.c.0.s8 %v470_v2  ;;  %v485_v35 = vcombine.high %v1969_v25, %v1969_v25  ;;  %s1879_s28 = scalar_lea.vmem %s1787_s2, 2272  ;;  %p1884_p2 = scmp.lt.s32.totalorder %s1787_s2, %s1787_s2 }
  0x2a   :  { %v1939_v5 = vsub.s32 0, %v96_v3  ;;  %v1941_v6 = vsub.s32 1, %v96_v3  ;;  %v1943_v7 = vsub.s32 2, %v96_v3  ;;  %v1945_v8 = vsub.s32 3, %v96_v3  ;;  %p1880_p1 = scmp.ne.s32.totalorder %s1787_s2, %s1879_s28  ;;  %p1885_p3 = scmp.lt.s32.totalorder %s1879_s28, %s1879_s28 }
  0x2b   :  { %v1947_v9 = vsub.s32 %v471_v4, %v96_v3  ;;  %v1949_v10 = vsub.s32 4, %v96_v3  ;;  %v1951_v11 = vsub.s32 5, %v96_v3  ;;  %v1955_v15 = vsub.s32 6, %v96_v3 }
  0x2c   :  { %v1957_v16 = vsub.s32 7, %v96_v3  ;;  %v98_v17 = vrot.slane %v77_v14, %v1939_v5  ;;  %v102_v18 = vrot.slane %v77_v14, %v1941_v6  ;;  %v106_v19 = vrot.slane %v77_v14, %v1943_v7  ;;  %p1886_p4 = por %p1885_p3, %p1884_p2 }
  0x2d   :  { %v110_v20 = vrot.slane %v77_v14, %v1945_v8  ;;  %v475_v22 = vrot.slane %v1953_v13, %v1947_v9  ;;  %v927_v23 = vrot.slane %v50_v12, %v1939_v5  ;;  %v931_v24 = vrot.slane %v50_v12, %v1941_v6 }
  0x2e   :  { %v935_v26 = vrot.slane %v50_v12, %v1943_v7  ;;  %v939_v27 = vrot.slane %v50_v12, %v1945_v8  ;;  %v114_v28 = vrot.slane %v77_v14, %v1949_v10  ;;  %v118_v29 = vrot.slane %v77_v14, %v1951_v11  ;;  %p1887_p5 = pnand %p1886_p4, %p1880_p1 }
  0x2f   :  { %v482_v30 = vrot.slane %v468_v21, %v1947_v9  ;;  %v483_v31 = vcombine.high %v475_v22, %v475_v22  ;;  %v844_v32 = vsub.f32 %v98_v17, %v475_v22  ;;  %v122_v33 = vrot.slane %v77_v14, %v1955_v15 }
  0x30   :  { %v126_v34 = vrot.slane %v77_v14, %v1957_v16  ;;  %v492_v36 = vrot.slane %v1969_v25, %v1947_v9  ;;  %v943_v37 = vrot.slane %v50_v12, %v1949_v10  ;;  %v499_v42 = vrot.slane %v485_v35, %v1947_v9 }
  0x31   :  { %v484_v38 = vcombine.high %v482_v30, %v482_v30  ;;  %v845_v39 = vsub.f32 %v102_v18, %v483_v31  ;;  %v846_v40 = vsub.f32 %v106_v19, %v482_v30  ;;  %v1279_v41 = vmul.f32 %v927_v23, %v844_v32 }
  0x32   :  { %v500_v43 = vcombine.high %v492_v36, %v492_v36  ;;  %v848_v44 = vsub.f32 %v114_v28, %v492_v36  ;;  %v947_v45 = vrot.slane %v50_v12, %v1951_v11  ;;  %v951_v50 = vrot.slane %v50_v12, %v1955_v15  ;;  %v2020_v36 = vld [vmem:[#allocation5 + $0x18] sm:$0xff] }
  0x33   :  { %v847_v47 = vsub.f32 %v110_v20, %v484_v38  ;;  %v1280_v48 = vmul.f32 %v931_v24, %v845_v39  ;;  %v1281_v49 = vmul.f32 %v935_v26, %v846_v40  ;;  %v501_v51 = vcombine.high %v499_v42, %v499_v42 }
  0x34   :  { %v849_v52 = vsub.f32 %v118_v29, %v500_v43  ;;  %v850_v53 = vsub.f32 %v122_v33, %v499_v42  ;;  %v955_v54 = vrot.slane %v50_v12, %v1957_v16  ;;  %v1283_v57 = vmul.f32 %v943_v37, %v848_v44 }
  0x35   :  { %v1282_v55 = vmul.f32 %v939_v27, %v847_v47  ;;  %v1421_v56 = vcombine.low %v1279_v41, %v1280_v48  ;;  %v130_v59 = vrot.slane %v1985_v46, %v1939_v5  ;;  %v851_v60 = vsub.f32 %v126_v34, %v501_v51 }
  0x36   :  { %v1284_v61 = vmul.f32 %v947_v45, %v849_v52  ;;  %v1285_v62 = vmul.f32 %v951_v50, %v850_v53  ;;  %v134_v0 = vrot.slane %v1985_v46, %v1941_v6  ;;  %v138_v3 = vrot.slane %v1985_v46, %v1943_v7 }
  0x37   :  { %v1422_v1 = vcombine.low %v1281_v49, %v1282_v55  ;;  %v1429_v2 = vrot.slane %v1421_v56, %v1947_v9  ;;  %v142_v4 = vrot.slane %v1985_v46, %v1945_v8  ;;  %v1286_v12 = vmul.f32 %v955_v54, %v851_v60  ;;  %v2035_v49 = vld [vmem:[#allocation7 + $0x10] sm:$0xff] }
  0x38   :  { %v1438_v14 = vcombine.low %v1283_v57, %v1284_v61  ;;  %v502_v17 = vcombine.high %v1989_v58, %v1989_v58  ;;  %v509_v18 = vrot.slane %v1989_v58, %v1947_v9  ;;  %v959_v20 = vrot.slane %v1993_v63, %v1939_v5 }
  0x39   :  { %v1436_v19 = vrot.slane %v1422_v1, %v1947_v9  ;;  %v963_v21 = vrot.slane %v1993_v63, %v1941_v6  ;;  %v967_v22 = vrot.slane %v1993_v63, %v1943_v7  ;;  %v1439_v23 = vcombine.low %v1285_v62, %v1286_v12 }
  0x3a   :  { %v1446_v24 = vrot.slane %v1438_v14, %v1947_v9  ;;  %v516_v26 = vrot.slane %v502_v17, %v1947_v9  ;;  %v517_v27 = vcombine.high %v509_v18, %v509_v18  ;;  %v852_v29 = vsub.f32 %v130_v59, %v509_v18 }
  0x3b   :  { %v1437_v28 = vcombine.low %v1429_v2, %v1436_v19  ;;  %v971_v30 = vrot.slane %v1993_v63, %v1945_v8  ;;  %v146_v31 = vrot.slane %v1985_v46, %v1949_v10  ;;  %v1453_v32 = vrot.slane %v1439_v23, %v1947_v9 }
  0x3c   :  { %v518_v33 = vcombine.high %v516_v26, %v516_v26  ;;  %v853_v34 = vsub.f32 %v134_v0, %v517_v27  ;;  %v854_v35 = vsub.f32 %v138_v3, %v516_v26  ;;  %v1287_v38 = vmul.f32 %v959_v20, %v852_v29  ;;  %v2050_v3 = vld [vmem:[#allocation2 + $0x10] sm:$0xff] }
  0x3d   :  { %v1744_v37 = vadd.f32 %v1437_v28, %v1953_v13  ;;  %v150_v39 = vrot.slane %v1985_v46, %v1951_v11  ;;  %v154_v40 = vrot.slane %v1985_v46, %v1955_v15  ;;  %v1454_v41 = vcombine.low %v1446_v24, %v1453_v32 }
  0x3e   :  { %v855_v42 = vsub.f32 %v142_v4, %v518_v33  ;;  %v1288_v43 = vmul.f32 %v963_v21, %v853_v34  ;;  %v1289_v44 = vmul.f32 %v967_v22, %v854_v35  ;;  %v158_v45 = vrot.slane %v1985_v46, %v1957_v16 }
  0x3f   :  { %1762 = vst [vmem:[#allocation8] sm:$0xff] %v1744_v37  ;;  %v519_v47 = vcombine.high %v2020_v36, %v2020_v36  ;;  %v526_v13 = vrot.slane %v2020_v36, %v1947_v9  ;;  %v975_v48 = vrot.slane %v1993_v63, %v1949_v10  ;;  %v1745_v50 = vadd.f32 %v1454_v41, %v1969_v25  ;;  %v2046_v25 = vld [vmem:[#allocation5 + $0x20] sm:$0xff] }
  0x40   :  { %v1290_v51 = vmul.f32 %v971_v30, %v855_v42  ;;  %v1455_v52 = vcombine.low %v1287_v38, %v1288_v43  ;;  %v979_v53 = vrot.slane %v1993_v63, %v1951_v11  ;;  %v983_v56 = vrot.slane %v1993_v63, %v1955_v15 }
  0x41   :  { %v533_v46 = vrot.slane %v519_v47, %v1947_v9  ;;  %v534_v54 = vcombine.high %v526_v13, %v526_v13  ;;  %v856_v55 = vsub.f32 %v146_v31, %v526_v13  ;;  %1763 = vst [vmem:[#allocation8 + $0x8] sm:$0xff] %v1745_v50  ;;  %v987_v60 = vrot.slane %v1993_v63, %v1957_v16 }
  0x42   :  { %v1456_v57 = vcombine.low %v1289_v44, %v1290_v51  ;;  %v1463_v59 = vrot.slane %v1455_v52, %v1947_v9  ;;  %v162_v61 = vrot.slane %v2035_v49, %v1939_v5  ;;  %v166_v12 = vrot.slane %v2035_v49, %v1941_v6 }
  0x43   :  { %v535_v62 = vcombine.high %v533_v46, %v533_v46  ;;  %v857_v0 = vsub.f32 %v150_v39, %v534_v54  ;;  %v858_v1 = vsub.f32 %v154_v40, %v533_v46  ;;  %v1291_v2 = vmul.f32 %v975_v48, %v856_v55  ;;  %v2074_v39 = vld [vmem:[#allocation5 + $0x28] sm:$0xff] }
  0x44   :  { %v1470_v4 = vrot.slane %v1456_v57, %v1947_v9  ;;  %v170_v14 = vrot.slane %v2035_v49, %v1943_v7  ;;  %v174_v63 = vrot.slane %v2035_v49, %v1945_v8  ;;  %v536_v20 = vcombine.high %v2046_v25, %v2046_v25 }
  0x45   :  { %v859_v17 = vsub.f32 %v158_v45, %v535_v62  ;;  %v1292_v18 = vmul.f32 %v979_v53, %v857_v0  ;;  %v1293_v19 = vmul.f32 %v983_v56, %v858_v1  ;;  %v543_v22 = vrot.slane %v2046_v25, %v1947_v9 }
  0x46   :  { %v1471_v21 = vcombine.low %v1463_v59, %v1470_v4  ;;  %v991_v23 = vrot.slane %v2050_v3, %v1939_v5  ;;  %v995_v24 = vrot.slane %v2050_v3, %v1941_v6  ;;  %v550_v28 = vrot.slane %v536_v20, %v1947_v9 }
  0x47   :  { %v1294_v26 = vmul.f32 %v987_v60, %v859_v17  ;;  %v1472_v27 = vcombine.low %v1291_v2, %v1292_v18  ;;  %v999_v29 = vrot.slane %v2050_v3, %v1943_v7  ;;  %v551_v31 = vcombine.high %v543_v22, %v543_v22  ;;  %v2105_v18 = vld [vmem:[#allocation2 + $0x18] sm:$0xff] }
  0x48   :  { %v1746_v30 = vadd.f32 %v1471_v21, %v1989_v58  ;;  %v860_v32 = vsub.f32 %v162_v61, %v543_v22  ;;  %v1003_v33 = vrot.slane %v2050_v3, %v1945_v8  ;;  %v552_v37 = vcombine.high %v550_v28, %v550_v28 }
  0x49   :  { %v1473_v34 = vcombine.low %v1293_v19, %v1294_v26  ;;  %v1480_v35 = vrot.slane %v1472_v27, %v1947_v9  ;;  %v862_v38 = vsub.f32 %v170_v14, %v550_v28  ;;  %v861_v40 = vsub.f32 %v166_v12, %v551_v31  ;;  %v2102_v14 = vld [vmem:[#allocation5 + $0x30] sm:$0xff] }
  0x4a   :  { %1764 = vst [vmem:[#allocation8 + $0x10] sm:$0xff] %v1746_v30  ;;  %v1295_v41 = vmul.f32 %v991_v23, %v860_v32  ;;  %v178_v42 = vrot.slane %v2035_v49, %v1949_v10  ;;  %v182_v58 = vrot.slane %v2035_v49, %v1951_v11  ;;  %v863_v44 = vsub.f32 %v174_v63, %v552_v37 }
  0x4b   :  { %v1487_v43 = vrot.slane %v1473_v34, %v1947_v9  ;;  %v1297_v45 = vmul.f32 %v999_v29, %v862_v38  ;;  %v186_v47 = vrot.slane %v2035_v49, %v1955_v15  ;;  %v1296_v13 = vmul.f32 %v995_v24, %v861_v40 }
  0x4c   :  { %v190_v48 = vrot.slane %v2035_v49, %v1957_v16  ;;  %v553_v50 = vcombine.high %v2074_v39, %v2074_v39  ;;  %v560_v51 = vrot.slane %v2074_v39, %v1947_v9  ;;  %v1298_v53 = vmul.f32 %v1003_v33, %v863_v44  ;;  %v2094_v49 = vld [vmem:[#allocation7 + $0x18] sm:$0xff] }
  0x4d   :  { %v1488_v52 = vcombine.low %v1480_v35, %v1487_v43  ;;  %v1007_v46 = vrot.slane %v2050_v3, %v1949_v10  ;;  %v1011_v54 = vrot.slane %v2050_v3, %v1951_v11  ;;  %v1489_v55 = vcombine.low %v1295_v41, %v1296_v13 }
  0x4e   :  { %v567_v56 = vrot.slane %v553_v50, %v1947_v9  ;;  %v568_v57 = vcombine.high %v560_v51, %v560_v51  ;;  %v864_v59 = vsub.f32 %v178_v42, %v560_v51  ;;  %v1490_v61 = vcombine.low %v1297_v45, %v1298_v53  ;;  %v2130_v45 = vld [vmem:[#allocation5 + $0x38] sm:$0xff] }
  0x4f   :  { %v1747_v60 = vadd.f32 %v1488_v52, %v2020_v36  ;;  %v1015_v62 = vrot.slane %v2050_v3, %v1955_v15  ;;  %v1019_v0 = vrot.slane %v2050_v3, %v1957_v16  ;;  %v1497_v1 = vrot.slane %v1489_v55, %v1947_v9 }
  0x50   :  { %v569_v2 = vcombine.high %v567_v56, %v567_v56  ;;  %v865_v4 = vsub.f32 %v182_v58, %v568_v57  ;;  %v866_v12 = vsub.f32 %v186_v47, %v567_v56  ;;  %v1504_v63 = vrot.slane %v1490_v61, %v1947_v9  ;;  %v2147_v57 = vld [vmem:[#allocation7 + $0x20] sm:$0xff] }
  0x51   :  { %1765 = vst [vmem:[#allocation8 + $0x18] sm:$0xff] %v1747_v60  ;;  %v1299_v17 = vmul.f32 %v1007_v46, %v864_v59  ;;  %v194_v36 = vrot.slane %v2094_v49, %v1939_v5  ;;  %v198_v19 = vrot.slane %v2094_v49, %v1941_v6  ;;  %v202_v22 = vrot.slane %v2094_v49, %v1943_v7 }
  0x52   :  { %v867_v3 = vsub.f32 %v190_v48, %v569_v2  ;;  %v1300_v20 = vmul.f32 %v1011_v54, %v865_v4  ;;  %v1301_v21 = vmul.f32 %v1015_v62, %v866_v12  ;;  %v1505_v23 = vcombine.low %v1497_v1, %v1504_v63 }
  0x53   :  { %v206_v24 = vrot.slane %v2094_v49, %v1945_v8  ;;  %v570_v26 = vcombine.high %v2102_v14, %v2102_v14  ;;  %v577_v27 = vrot.slane %v2102_v14, %v1947_v9  ;;  %v1023_v30 = vrot.slane %v2105_v18, %v1939_v5 }
  0x54   :  { %v1302_v28 = vmul.f32 %v1019_v0, %v867_v3  ;;  %v1506_v29 = vcombine.low %v1299_v17, %v1300_v20  ;;  %v1027_v31 = vrot.slane %v2105_v18, %v1941_v6  ;;  %v1748_v32 = vadd.f32 %v1505_v23, %v2046_v25  ;;  %v2158_v17 = vld [vmem:[#allocation5 + $0x40] sm:$0xff] }
  0x55   :  { %v584_v33 = vrot.slane %v570_v26, %v1947_v9  ;;  %v585_v34 = vcombine.high %v577_v27, %v577_v27  ;;  %v868_v35 = vsub.f32 %v194_v36, %v577_v27  ;;  %v1031_v40 = vrot.slane %v2105_v18, %v1943_v7 }
  0x56   :  { %v1507_v37 = vcombine.low %v1301_v21, %v1302_v28  ;;  %v1514_v38 = vrot.slane %v1506_v29, %v1947_v9  ;;  %v1035_v41 = vrot.slane %v2105_v18, %v1945_v8  ;;  %1766 = vst [vmem:[#allocation8 + $0x20] sm:$0xff] %v1748_v32  ;;  %v210_v47 = vrot.slane %v2094_v49, %v1949_v10  ;;  %v2162_v21 = vld [vmem:[#allocation2 + $0x20] sm:$0xff] }
  0x57   :  { %v586_v42 = vcombine.high %v584_v33, %v584_v33  ;;  %v869_v58 = vsub.f32 %v198_v19, %v585_v34  ;;  %v870_v43 = vsub.f32 %v202_v22, %v584_v33  ;;  %v1303_v44 = vmul.f32 %v1023_v30, %v868_v35 }
  0x58   :  { %v1521_v25 = vrot.slane %v1507_v37, %v1947_v9  ;;  %v214_v13 = vrot.slane %v2094_v49, %v1951_v11  ;;  %v218_v48 = vrot.slane %v2094_v49, %v1955_v15  ;;  %v222_v53 = vrot.slane %v2094_v49, %v1957_v16 }
  0x59   :  { %v871_v50 = vsub.f32 %v206_v24, %v586_v42  ;;  %v1304_v51 = vmul.f32 %v1027_v31, %v869_v58  ;;  %v1305_v52 = vmul.f32 %v1031_v40, %v870_v43  ;;  %v587_v54 = vcombine.high %v2130_v45, %v2130_v45 }
  0x5a   :  { %v1522_v46 = vcombine.low %v1514_v38, %v1521_v25  ;;  %v594_v55 = vrot.slane %v2130_v45, %v1947_v9  ;;  %v1039_v56 = vrot.slane %v2105_v18, %v1949_v10  ;;  %v1043_v61 = vrot.slane %v2105_v18, %v1951_v11 }
  0x5b   :  { %v1306_v59 = vmul.f32 %v1035_v41, %v871_v50  ;;  %v1523_v60 = vcombine.low %v1303_v44, %v1304_v51  ;;  %v1047_v49 = vrot.slane %v2105_v18, %v1955_v15  ;;  %v601_v0 = vrot.slane %v587_v54, %v1947_v9 }
  0x5c   :  { %v1749_v62 = vadd.f32 %v1522_v46, %v2074_v39  ;;  %v602_v1 = vcombine.high %v594_v55, %v594_v55  ;;  %v872_v2 = vsub.f32 %v210_v47, %v594_v55  ;;  %v1051_v63 = vrot.slane %v2105_v18, %v1957_v16 }
  0x5d   :  { %v1524_v4 = vcombine.low %v1305_v52, %v1306_v59  ;;  %v1531_v12 = vrot.slane %v1523_v60, %v1947_v9  ;;  %v226_v36 = vrot.slane %v2147_v57, %v1939_v5  ;;  %v603_v19 = vcombine.high %v601_v0, %v601_v0 }
  0x5e   :  { %1767 = vst [vmem:[#allocation8 + $0x28] sm:$0xff] %v1749_v62  ;;  %v873_v3 = vsub.f32 %v214_v13, %v602_v1  ;;  %v874_v20 = vsub.f32 %v218_v48, %v601_v0  ;;  %v1307_v39 = vmul.f32 %v1039_v56, %v872_v2  ;;  %v230_v23 = vrot.slane %v2147_v57, %v1941_v6  ;;  %v2186_v13 = vld [vmem:[#allocation5 + $0x48] sm:$0xff] }
  0x5f   :  { %v1538_v22 = vrot.slane %v1524_v4, %v1947_v9  ;;  %v234_v18 = vrot.slane %v2147_v57, %v1943_v7  ;;  %v238_v24 = vrot.slane %v2147_v57, %v1945_v8  ;;  %v875_v26 = vsub.f32 %v222_v53, %v603_v19 }
  0x60   :  { %v1308_v27 = vmul.f32 %v1043_v61, %v873_v3  ;;  %v1309_v28 = vmul.f32 %v1047_v49, %v874_v20  ;;  %v604_v29 = vcombine.high %v2158_v17, %v2158_v17  ;;  %v611_v31 = vrot.slane %v2158_v17, %v1947_v9 }
  0x61   :  { %v1539_v30 = vcombine.low %v1531_v12, %v1538_v22  ;;  %v1055_v32 = vrot.slane %v2162_v21, %v1939_v5  ;;  %v1059_v33 = vrot.slane %v2162_v21, %v1941_v6  ;;  %v1310_v34 = vmul.f32 %v1051_v63, %v875_v26 }
  0x62   :  { %v1540_v35 = vcombine.low %v1307_v39, %v1308_v27  ;;  %v618_v37 = vrot.slane %v604_v29, %v1947_v9  ;;  %v1063_v38 = vrot.slane %v2162_v21, %v1943_v7  ;;  %v619_v41 = vcombine.high %v611_v31, %v611_v31  ;;  %v2217_v27 = vld [vmem:[#allocation2 + $0x28] sm:$0xff] }
  0x63   :  { %v1750_v40 = vadd.f32 %v1539_v30, %v2102_v14  ;;  %v876_v42 = vsub.f32 %v226_v36, %v611_v31  ;;  %v1067_v58 = vrot.slane %v2162_v21, %v1945_v8  ;;  %v1541_v43 = vcombine.low %v1309_v28, %v1310_v34 }
  0x64   :  { %v1548_v44 = vrot.slane %v1540_v35, %v1947_v9  ;;  %v620_v25 = vcombine.high %v618_v37, %v618_v37  ;;  %v878_v47 = vsub.f32 %v234_v18, %v618_v37  ;;  %v877_v48 = vsub.f32 %v230_v23, %v619_v41  ;;  %v2214_v18 = vld [vmem:[#allocation5 + $0x50] sm:$0xff] }
  0x65   :  { %1768 = vst [vmem:[#allocation8 + $0x30] sm:$0xff] %v1750_v40  ;;  %v1311_v50 = vmul.f32 %v1055_v32, %v876_v42  ;;  %v242_v51 = vrot.slane %v2147_v57, %v1949_v10  ;;  %v246_v14 = vrot.slane %v2147_v57, %v1951_v11  ;;  %v1555_v52 = vrot.slane %v1541_v43, %v1947_v9 }
  0x66   :  { %v879_v53 = vsub.f32 %v238_v24, %v620_v25  ;;  %v1313_v46 = vmul.f32 %v1063_v38, %v878_v47  ;;  %v250_v54 = vrot.slane %v2147_v57, %v1955_v15  ;;  %v1312_v55 = vmul.f32 %v1059_v33, %v877_v48 }
  0x67   :  { %v254_v56 = vrot.slane %v2147_v57, %v1957_v16  ;;  %v621_v59 = vcombine.high %v2186_v13, %v2186_v13  ;;  %v628_v60 = vrot.slane %v2186_v13, %v1947_v9  ;;  %v1556_v61 = vcombine.low %v1548_v44, %v1555_v52  ;;  %v2206_v57 = vld [vmem:[#allocation7 + $0x28] sm:$0xff] }
  0x68   :  { %v1314_v49 = vmul.f32 %v1067_v58, %v879_v53  ;;  %v1071_v62 = vrot.slane %v2162_v21, %v1949_v10  ;;  %v1075_v0 = vrot.slane %v2162_v21, %v1951_v11  ;;  %v1557_v1 = vcombine.low %v1311_v50, %v1312_v55 }
  0x69   :  { %v635_v2 = vrot.slane %v621_v59, %v1947_v9  ;;  %v636_v4 = vcombine.high %v628_v60, %v628_v60  ;;  %v880_v12 = vsub.f32 %v242_v51, %v628_v60  ;;  %v1751_v63 = vadd.f32 %v1556_v61, %v2130_v45 }
  0x6a   :  { %v1558_v36 = vcombine.low %v1313_v46, %v1314_v49  ;;  %v1079_v19 = vrot.slane %v2162_v21, %v1955_v15  ;;  %v1083_v3 = vrot.slane %v2162_v21, %v1957_v16  ;;  %v1565_v20 = vrot.slane %v1557_v1, %v1947_v9  ;;  %v2242_v46 = vld [vmem:[#allocation5 + $0x58] sm:$0xff] }
  0x6b   :  { %v637_v39 = vcombine.high %v635_v2, %v635_v2  ;;  %v881_v22 = vsub.f32 %v246_v14, %v636_v4  ;;  %v882_v23 = vsub.f32 %v250_v54, %v635_v2  ;;  %1769 = vst [vmem:[#allocation8 + $0x38] sm:$0xff] %v1751_v63  ;;  %v1315_v26 = vmul.f32 %v1071_v62, %v880_v12  ;;  %v2259_v4 = vld [vmem:[#allocation7 + $0x30] sm:$0xff] }
  0x6c   :  { %v1572_v24 = vrot.slane %v1558_v36, %v1947_v9  ;;  %v258_v45 = vrot.slane %v2206_v57, %v1939_v5  ;;  %v262_v28 = vrot.slane %v2206_v57, %v1941_v6  ;;  %v266_v31 = vrot.slane %v2206_v57, %v1943_v7 }
  0x6d   :  { %v883_v21 = vsub.f32 %v254_v56, %v637_v39  ;;  %v1316_v29 = vmul.f32 %v1075_v0, %v881_v22  ;;  %v1317_v30 = vmul.f32 %v1079_v19, %v882_v23  ;;  %v270_v33 = vrot.slane %v2206_v57, %v1945_v8 }
  0x6e   :  { %v1573_v32 = vcombine.low %v1565_v20, %v1572_v24  ;;  %v638_v34 = vcombine.high %v2214_v18, %v2214_v18  ;;  %v645_v35 = vrot.slane %v2214_v18, %v1947_v9  ;;  %v1087_v40 = vrot.slane %v2217_v27, %v1939_v5 }
  0x6f   :  { %v1318_v37 = vmul.f32 %v1083_v3, %v883_v21  ;;  %v1574_v38 = vcombine.low %v1315_v26, %v1316_v29  ;;  %v1091_v41 = vrot.slane %v2217_v27, %v1941_v6  ;;  %v1095_v48 = vrot.slane %v2217_v27, %v1943_v7  ;;  %v2270_v26 = vld [vmem:[#allocation5 + $0x60] sm:$0xff] }
  0x70   :  { %v1752_v42 = vadd.f32 %v1573_v32, %v2158_v17  ;;  %v652_v58 = vrot.slane %v638_v34, %v1947_v9  ;;  %v653_v43 = vcombine.high %v645_v35, %v645_v35  ;;  %v884_v44 = vsub.f32 %v258_v45, %v645_v35 }
  0x71   :  { %v1575_v25 = vcombine.low %v1317_v30, %v1318_v37  ;;  %v1582_v47 = vrot.slane %v1574_v38, %v1947_v9  ;;  %v1099_v50 = vrot.slane %v2217_v27, %v1945_v8  ;;  %v274_v54 = vrot.slane %v2206_v57, %v1949_v10  ;;  %v2274_v30 = vld [vmem:[#allocation2 + $0x30] sm:$0xff] }
  0x72   :  { %1770 = vst [vmem:[#allocation8 + $0x40] sm:$0xff] %v1752_v42  ;;  %v654_v51 = vcombine.high %v652_v58, %v652_v58  ;;  %v885_v14 = vsub.f32 %v262_v28, %v653_v43  ;;  %v886_v52 = vsub.f32 %v266_v31, %v652_v58  ;;  %v1319_v53 = vmul.f32 %v1087_v40, %v884_v44 }
  0x73   :  { %v1589_v17 = vrot.slane %v1575_v25, %v1947_v9  ;;  %v278_v55 = vrot.slane %v2206_v57, %v1951_v11  ;;  %v282_v56 = vrot.slane %v2206_v57, %v1955_v15  ;;  %v286_v49 = vrot.slane %v2206_v57, %v1957_v16 }
  0x74   :  { %v887_v59 = vsub.f32 %v270_v33, %v654_v51  ;;  %v1320_v60 = vmul.f32 %v1091_v41, %v885_v14  ;;  %v1321_v61 = vmul.f32 %v1095_v48, %v886_v52  ;;  %v655_v0 = vcombine.high %v2242_v46, %v2242_v46 }
  0x75   :  { %v1590_v62 = vcombine.low %v1582_v47, %v1589_v17  ;;  %v662_v1 = vrot.slane %v2242_v46, %v1947_v9  ;;  %v1103_v2 = vrot.slane %v2217_v27, %v1949_v10  ;;  %v1107_v36 = vrot.slane %v2217_v27, %v1951_v11 }
  0x76   :  { %v1322_v12 = vmul.f32 %v1099_v50, %v887_v59  ;;  %v1591_v63 = vcombine.low %v1319_v53, %v1320_v60  ;;  %v1111_v57 = vrot.slane %v2217_v27, %v1955_v15  ;;  %v669_v3 = vrot.slane %v655_v0, %v1947_v9 }
  0x77   :  { %v1753_v19 = vadd.f32 %v1590_v62, %v2186_v13  ;;  %v670_v20 = vcombine.high %v662_v1, %v662_v1  ;;  %v888_v39 = vsub.f32 %v274_v54, %v662_v1  ;;  %v1115_v24 = vrot.slane %v2217_v27, %v1957_v16 }
  0x78   :  { %v1592_v22 = vcombine.low %v1321_v61, %v1322_v12  ;;  %v1599_v23 = vrot.slane %v1591_v63, %v1947_v9  ;;  %v290_v45 = vrot.slane %v2259_v4, %v1939_v5  ;;  %v671_v28 = vcombine.high %v669_v3, %v669_v3 }
  0x79   :  { %1771 = vst [vmem:[#allocation8 + $0x48] sm:$0xff] %v1753_v19  ;;  %v889_v21 = vsub.f32 %v278_v55, %v670_v20  ;;  %v890_v29 = vsub.f32 %v282_v56, %v669_v3  ;;  %v1323_v13 = vmul.f32 %v1103_v2, %v888_v39  ;;  %v294_v32 = vrot.slane %v2259_v4, %v1941_v6  ;;  %v2298_v55 = vld [vmem:[#allocation5 + $0x68] sm:$0xff] }
  0x7a   :  { %v1606_v31 = vrot.slane %v1592_v22, %v1947_v9  ;;  %v298_v27 = vrot.slane %v2259_v4, %v1943_v7  ;;  %v302_v33 = vrot.slane %v2259_v4, %v1945_v8  ;;  %v891_v34 = vsub.f32 %v286_v49, %v671_v28 }
  0x7b   :  { %v1324_v35 = vmul.f32 %v1107_v36, %v889_v21  ;;  %v1325_v37 = vmul.f32 %v1111_v57, %v890_v29  ;;  %v672_v38 = vcombine.high %v2270_v26, %v2270_v26  ;;  %v679_v41 = vrot.slane %v2270_v26, %v1947_v9 }
  0x7c   :  { %v1607_v40 = vcombine.low %v1599_v23, %v1606_v31  ;;  %v1119_v42 = vrot.slane %v2274_v30, %v1939_v5  ;;  %v1123_v58 = vrot.slane %v2274_v30, %v1941_v6  ;;  %v1326_v43 = vmul.f32 %v1115_v24, %v891_v34 }
  0x7d   :  { %v1608_v44 = vcombine.low %v1323_v13, %v1324_v35  ;;  %v686_v25 = vrot.slane %v672_v38, %v1947_v9  ;;  %v1127_v47 = vrot.slane %v2274_v30, %v1943_v7  ;;  %v687_v50 = vcombine.high %v679_v41, %v679_v41  ;;  %v2329_v35 = vld [vmem:[#allocation2 + $0x38] sm:$0xff] }
  0x7e   :  { %v1754_v48 = vadd.f32 %v1607_v40, %v2214_v18  ;;  %v892_v51 = vsub.f32 %v290_v45, %v679_v41  ;;  %v1131_v14 = vrot.slane %v2274_v30, %v1945_v8  ;;  %v1609_v52 = vcombine.low %v1325_v37, %v1326_v43 }
  0x7f   :  { %v1616_v53 = vrot.slane %v1608_v44, %v1947_v9  ;;  %v688_v17 = vcombine.high %v686_v25, %v686_v25  ;;  %v894_v54 = vsub.f32 %v298_v27, %v686_v25  ;;  %v893_v56 = vsub.f32 %v294_v32, %v687_v50  ;;  %v2326_v27 = vld [vmem:[#allocation5 + $0x70] sm:$0xff] }
  0x80   :  { %1772 = vst [vmem:[#allocation8 + $0x50] sm:$0xff] %v1754_v48  ;;  %v1327_v59 = vmul.f32 %v1119_v42, %v892_v51  ;;  %v306_v60 = vrot.slane %v2259_v4, %v1949_v10  ;;  %v310_v18 = vrot.slane %v2259_v4, %v1951_v11  ;;  %v1623_v61 = vrot.slane %v1609_v52, %v1947_v9 }
  0x81   :  { %v895_v49 = vsub.f32 %v302_v33, %v688_v17  ;;  %v1329_v62 = vmul.f32 %v1127_v47, %v894_v54  ;;  %v314_v0 = vrot.slane %v2259_v4, %v1955_v15  ;;  %v1328_v1 = vmul.f32 %v1123_v58, %v893_v56 }
  0x82   :  { %v318_v2 = vrot.slane %v2259_v4, %v1957_v16  ;;  %v689_v12 = vcombine.high %v2298_v55, %v2298_v55  ;;  %v696_v63 = vrot.slane %v2298_v55, %v1947_v9  ;;  %v1624_v36 = vcombine.low %v1616_v53, %v1623_v61  ;;  %v2318_v4 = vld [vmem:[#allocation7 + $0x38] sm:$0xff] }
  0x83   :  { %v1330_v57 = vmul.f32 %v1131_v14, %v895_v49  ;;  %v1135_v19 = vrot.slane %v2274_v30, %v1949_v10  ;;  %v1139_v3 = vrot.slane %v2274_v30, %v1951_v11  ;;  %v1625_v20 = vcombine.low %v1327_v59, %v1328_v1 }
  0x84   :  { %v703_v39 = vrot.slane %v689_v12, %v1947_v9  ;;  %v704_v22 = vcombine.high %v696_v63, %v696_v63  ;;  %v896_v23 = vsub.f32 %v306_v60, %v696_v63  ;;  %v1755_v24 = vadd.f32 %v1624_v36, %v2242_v46 }
  0x85   :  { %v1626_v45 = vcombine.low %v1329_v62, %v1330_v57  ;;  %v1143_v28 = vrot.slane %v2274_v30, %v1955_v15  ;;  %v1147_v21 = vrot.slane %v2274_v30, %v1957_v16  ;;  %v1633_v29 = vrot.slane %v1625_v20, %v1947_v9  ;;  %v2354_v62 = vld [vmem:[#allocation5 + $0x78] sm:$0xff] }
  0x86   :  { %v705_v13 = vcombine.high %v703_v39, %v703_v39  ;;  %v897_v31 = vsub.f32 %v310_v18, %v704_v22  ;;  %v898_v32 = vsub.f32 %v314_v0, %v703_v39  ;;  %1773 = vst [vmem:[#allocation8 + $0x58] sm:$0xff] %v1755_v24  ;;  %v1331_v34 = vmul.f32 %v1135_v19, %v896_v23  ;;  %v2371_v22 = vld [vmem:[#allocation7 + $0x40] sm:$0xff] }
  0x87   :  { %v1640_v33 = vrot.slane %v1626_v45, %v1947_v9  ;;  %v322_v46 = vrot.slane %v2318_v4, %v1939_v5  ;;  %v326_v37 = vrot.slane %v2318_v4, %v1941_v6  ;;  %v330_v41 = vrot.slane %v2318_v4, %v1943_v7 }
  0x88   :  { %v899_v30 = vsub.f32 %v318_v2, %v705_v13  ;;  %v1332_v38 = vmul.f32 %v1139_v3, %v897_v31  ;;  %v1333_v40 = vmul.f32 %v1143_v28, %v898_v32  ;;  %v334_v58 = vrot.slane %v2318_v4, %v1945_v8 }
  0x89   :  { %v1641_v42 = vcombine.low %v1633_v29, %v1640_v33  ;;  %v706_v43 = vcombine.high %v2326_v27, %v2326_v27  ;;  %v713_v44 = vrot.slane %v2326_v27, %v1947_v9  ;;  %v1151_v48 = vrot.slane %v2329_v35, %v1939_v5 }
  0x8a   :  { %v1334_v25 = vmul.f32 %v1147_v21, %v899_v30  ;;  %v1642_v47 = vcombine.low %v1331_v34, %v1332_v38  ;;  %v1155_v50 = vrot.slane %v2329_v35, %v1941_v6  ;;  %v1159_v56 = vrot.slane %v2329_v35, %v1943_v7  ;;  %v2382_v34 = vld [vmem:[#allocation5 + $0x80] sm:$0xff] }
  0x8b   :  { %v1756_v51 = vadd.f32 %v1641_v42, %v2270_v26  ;;  %v720_v14 = vrot.slane %v706_v43, %v1947_v9  ;;  %v721_v52 = vcombine.high %v713_v44, %v713_v44  ;;  %v900_v53 = vsub.f32 %v322_v46, %v713_v44 }
  0x8c   :  { %v1643_v17 = vcombine.low %v1333_v40, %v1334_v25  ;;  %v1650_v54 = vrot.slane %v1642_v47, %v1947_v9  ;;  %v1163_v59 = vrot.slane %v2329_v35, %v1945_v8  ;;  %v338_v0 = vrot.slane %v2318_v4, %v1949_v10  ;;  %v58_v40 = vld [vmem:[#allocation2 + $0x40] sm:$0xff] }
  0x8d   :  { %1774 = vst [vmem:[#allocation8 + $0x60] sm:$0xff] %v1756_v51  ;;  %v722_v60 = vcombine.high %v720_v14, %v720_v14  ;;  %v901_v18 = vsub.f32 %v326_v37, %v721_v52  ;;  %v902_v61 = vsub.f32 %v330_v41, %v720_v14  ;;  %v1335_v49 = vmul.f32 %v1151_v48, %v900_v53 }
  0x8e   :  { %v1657_v26 = vrot.slane %v1643_v17, %v1947_v9  ;;  %v342_v1 = vrot.slane %v2318_v4, %v1951_v11  ;;  %v346_v2 = vrot.slane %v2318_v4, %v1955_v15  ;;  %v350_v57 = vrot.slane %v2318_v4, %v1957_v16 }
  0x8f   :  { %v903_v12 = vsub.f32 %v334_v58, %v722_v60  ;;  %v1336_v63 = vmul.f32 %v1155_v50, %v901_v18  ;;  %v1337_v36 = vmul.f32 %v1159_v56, %v902_v61  ;;  %v723_v3 = vcombine.high %v2354_v62, %v2354_v62 }
  0x90   :  { %v1658_v19 = vcombine.low %v1650_v54, %v1657_v26  ;;  %v730_v20 = vrot.slane %v2354_v62, %v1947_v9  ;;  %v1167_v39 = vrot.slane %v2329_v35, %v1949_v10  ;;  %v1171_v45 = vrot.slane %v2329_v35, %v1951_v11 }
  0x91   :  { %v1338_v23 = vmul.f32 %v1163_v59, %v903_v12  ;;  %v1659_v24 = vcombine.low %v1335_v49, %v1336_v63  ;;  %v1175_v4 = vrot.slane %v2329_v35, %v1955_v15  ;;  %v737_v21 = vrot.slane %v723_v3, %v1947_v9 }
  0x92   :  { %v1757_v28 = vadd.f32 %v1658_v19, %v2298_v55  ;;  %v738_v29 = vcombine.high %v730_v20, %v730_v20  ;;  %v904_v13 = vsub.f32 %v338_v0, %v730_v20  ;;  %v1179_v33 = vrot.slane %v2329_v35, %v1957_v16 }
  0x93   :  { %v1660_v31 = vcombine.low %v1337_v36, %v1338_v23  ;;  %v1667_v32 = vrot.slane %v1659_v24, %v1947_v9  ;;  %v354_v46 = vrot.slane %v2371_v22, %v1939_v5  ;;  %v739_v37 = vcombine.high %v737_v21, %v737_v21 }
  0x94   :  { %1775 = vst [vmem:[#allocation8 + $0x68] sm:$0xff] %v1757_v28  ;;  %v905_v30 = vsub.f32 %v342_v1, %v738_v29  ;;  %v906_v38 = vsub.f32 %v346_v2, %v737_v21  ;;  %v1339_v55 = vmul.f32 %v1167_v39, %v904_v13  ;;  %v358_v42 = vrot.slane %v2371_v22, %v1941_v6 }
  0x95   :  { %v1674_v41 = vrot.slane %v1660_v31, %v1947_v9  ;;  %v362_v58 = vrot.slane %v2371_v22, %v1943_v7  ;;  %v366_v16 = vrot.slane %v2371_v22, %v1945_v8  ;;  %v907_v35 = vsub.f32 %v350_v57, %v739_v37 }
  0x96   :  { %v1340_v43 = vmul.f32 %v1171_v45, %v905_v30  ;;  %v1341_v44 = vmul.f32 %v1175_v4, %v906_v38  ;;  %v740_v25 = vcombine.high %v2382_v34, %v2382_v34  ;;  %v747_v48 = vrot.slane %v2382_v34, %v1947_v9 }
  0x97   :  { %v1675_v47 = vcombine.low %v1667_v32, %v1674_v41  ;;  %v1183_v50 = vrot.slane %v58_v40, %v1939_v5  ;;  %v1187_v51 = vrot.slane %v58_v40, %v1941_v6  ;;  %v1342_v14 = vmul.f32 %v1179_v33, %v907_v35  ;;  %v76_v5 = vld [vmem:[#allocation5 + $0x88] sm:$0x3f] }
  0x98   :  { %v1676_v52 = vcombine.low %v1339_v55, %v1340_v43  ;;  %v754_v53 = vrot.slane %v740_v25, %v1947_v9  ;;  %v1191_v17 = vrot.slane %v58_v40, %v1943_v7  ;;  %v755_v56 = vcombine.high %v747_v48, %v747_v48 }
  0x99   :  { %v1758_v54 = vadd.f32 %v1675_v47, %v2326_v27  ;;  %v908_v59 = vsub.f32 %v354_v46, %v747_v48  ;;  %v1195_v60 = vrot.slane %v58_v40, %v1945_v8  ;;  %v1677_v18 = vcombine.low %v1341_v44, %v1342_v14 }
  0x9a   :  { %v1684_v61 = vrot.slane %v1676_v52, %v1947_v9  ;;  %v756_v49 = vcombine.high %v754_v53, %v754_v53  ;;  %v910_v26 = vsub.f32 %v362_v58, %v754_v53  ;;  %v909_v6 = vsub.f32 %v358_v42, %v755_v56 }
  0x9b   :  { %1776 = vst [vmem:[#allocation8 + $0x70] sm:$0xff] %v1758_v54  ;;  %v1343_v0 = vmul.f32 %v1183_v50, %v908_v59  ;;  %v370_v1 = vrot.slane %v2371_v22, %v1949_v10  ;;  %v374_v7 = vrot.slane %v2371_v22, %v1951_v11  ;;  %v1691_v27 = vrot.slane %v1677_v18, %v1947_v9 }
  0x9c   :  { %v911_v2 = vsub.f32 %v366_v16, %v756_v49  ;;  %v1345_v12 = vmul.f32 %v1191_v17, %v910_v26  ;;  %v378_v8 = vrot.slane %v2371_v22, %v1955_v15  ;;  %v1344_v63 = vmul.f32 %v1187_v51, %v909_v6 }
  0x9d   :  { %v757_v36 = vcombine.high %v76_v5, %v76_v5  ;;  %v764_v57 = vrot.slane %v76_v5, %v1947_v9  ;;  %v1199_v19 = vrot.slane %v58_v40, %v1949_v10  ;;  %v1692_v3 = vcombine.low %v1684_v61, %v1691_v27 }
  0x9e   :  { %v1346_v20 = vmul.f32 %v1195_v60, %v911_v2  ;;  %v1203_v39 = vrot.slane %v58_v40, %v1951_v11  ;;  %v1207_v23 = vrot.slane %v58_v40, %v1955_v15  ;;  %v1693_v24 = vcombine.low %v1343_v0, %v1344_v63 }
  0x9f   :  { %v771_v45 = vrot.slane %v757_v36, %v1947_v9  ;;  %v772_v4 = vcombine.high %v764_v57, %v764_v57  ;;  %v912_v28 = vsub.f32 %v370_v1, %v764_v57  ;;  %v1759_v21 = vadd.f32 %v1692_v3, %v2354_v62 }
  0xa0   :  { %v1694_v22 = vcombine.low %v1345_v12, %v1346_v20  ;;  %v1701_v29 = vrot.slane %v1693_v24, %v1947_v9 }
  0xa1   :  { %v913_v13 = vsub.f32 %v374_v7, %v772_v4  ;;  %v914_v31 = vsub.f32 %v378_v8, %v771_v45  ;;  %v1347_v32 = vmul.f32 %v1199_v19, %v912_v28  ;;  %1777 = vst [vmem:[#allocation8 + $0x78] sm:$0xff] %v1759_v21 }
  0xa2   :  { %v1708_v10 = vrot.slane %v1694_v22, %v1947_v9 }
  0xa3   :  { %v1348_v33 = vmul.f32 %v1203_v39, %v913_v13  ;;  %v1349_v11 = vmul.f32 %v1207_v23, %v914_v31 }
  0xa4   :  { %v1709_v46 = vcombine.low %v1701_v29, %v1708_v10 }
  0xa5   :  { %v1710_v15 = vcombine.low %v1347_v32, %v1348_v33  ;;  %v1724_v37 = vrot.slane %v1349_v11, %v1947_v9 }
  0xa6   :  { %v1760_v30 = vadd.f32 %v1709_v46, %v2382_v34 }
  0xa7   :  { %v1717_v38 = vrot.slane %v1710_v15, %v1947_v9 }
  0xa8   :  { %1778 = vst [vmem:[#allocation8 + $0x80] sm:$0xff] %v1760_v30 }
  0xa9   :  { %v1725_v62 = vcombine.low %v1717_v38, %v1724_v37 }
  0xab   :  { %v1761_v55 = vadd.f32 %v1725_v62, %v76_v5 }
  0xad   :  { %1779 = vst [vmem:[#allocation8 + $0x88] sm:$0x3f] %v1761_v55 }
  0xae   :  { %1890 = shalt.err (!%p1887_p5)
}
  0xaf   :  { %1789 = dma.vmem_to_hbm [thread:$0]  %s1787_s2, 2272, %s2428_s3, [#allocation4]  }
  0xb0   :  { %1903 = dma.done.wait [#allocation4], 2272  }
  0xb1   :  { %1904 = vsyncadd [#allocation4], 4294965024 }
  0xb2   :  { %1793 = vsyncpa [#allocation3], 1 }
  0xb3   :  { %1794 = vsyncpa [#allocation6], 1 }
  0xb4   :  { %1795 = vsyncpa [#allocation4], 1 }

</bundles_post_ra>
